<compile_context>
chip_gen: v5e
topology: v5e:2x2
jax: 0.10.0
libtpu: 0.0.40
codegen_flags: <defaults>
</compile_context>

<pallas_src>
import functools

import jax
import jax.numpy as jnp
from jax.experimental import pallas as pl
from jax.experimental.pallas import tpu as pltpu

MAX_LENGTH = 10
HIDDEN = 32
OUTPUT = 24
NUM_LAYERS = 2


def attn_decoder_kernel(tok_ref, const_ref, act_ref, w_ref, out_ref, *,
                        hidden_size, output_size, max_length, num_layers):
    del tok_ref  # only used by the index_map gather
    H, OUT, ML, NL = hidden_size, output_size, max_length, num_layers

    # gathered constant row block: (1, 2+NL, 128)
    #   row 0: [e@W_attn_e + b_attn | e@W_comb_e + b_comb | 0...]
    #   rows 1..NL: b_ih[l] + b_hh[l]    row 1+NL: b_out
    cst = const_ref[0]                                               # (2+NL, 128)
    frow = cst[0:1, :]                                               # (1, 128)

    enc_bf = act_ref[0:ML, :].astype(jnp.bfloat16)                   # (ML, H)
    h0_bf = act_ref[ML:ML + 1, :].astype(jnp.bfloat16)               # (1, H)

    # E' = encoder_outputs @ W_comb_a  -- independent of the softmax chain,
    # overlaps the front matmul (re-associated context matmul).
    eprime = jnp.dot(enc_bf, w_ref[:, 128:128 + H],
                     preferred_element_type=jnp.float32)             # (ML, H)

    # attention scores = (e-part precomputed in frow) + h0 @ W_attn_h + b_attn
    front_h = jnp.dot(h0_bf, w_ref[:, 0:128],
                      preferred_element_type=jnp.float32)            # (1, 128)
    scores = frow[:, 0:ML] + front_h[:, 0:ML]                        # (1, ML)
    scores = scores - jnp.max(scores, axis=1, keepdims=True)
    ex = jnp.exp(scores)
    attn_w = ex * pl.reciprocal(jnp.sum(ex, axis=1, keepdims=True), approx=True)

    # output = relu(attn_combine(cat(embedded, attn_applied)))
    comb_e = frow[:, ML:ML + H]                                      # (1, H)
    comb_a = jnp.dot(attn_w.astype(jnp.bfloat16), eprime.astype(jnp.bfloat16),
                     preferred_element_type=jnp.float32)             # (1, H)
    x = jnp.maximum(comb_e + comb_a, 0.0)                            # (1, H)

    # ---- stacked LSTM, single step, h0 = c0 = 0 (W_hh / forget path drop out)
    hs = []
    for l in range(NL):
        blk = 128 * (2 + l)
        gates = jnp.dot(x.astype(jnp.bfloat16), w_ref[:, blk:blk + 4 * H],
                        preferred_element_type=jnp.float32)          # (1, 4H)
        gates = gates + cst[1 + l:2 + l, 0:4 * H]                    # b_ih + b_hh
        i_g = jax.nn.sigmoid(gates[:, 0:H])
        g_g = jnp.tanh(gates[:, 2 * H:3 * H])
        o_g = jax.nn.sigmoid(gates[:, 3 * H:4 * H])
        h = o_g * jnp.tanh(i_g * g_g)
        hs.append(h)
        x = h

    # ---- output projection + log_softmax
    last = 128 * (2 + NL)
    logits = (jnp.dot(x.astype(jnp.bfloat16), w_ref[:, last:last + OUT],
                      preferred_element_type=jnp.float32)
              + cst[1 + NL:2 + NL, 0:OUT])
    z = logits - jnp.max(logits, axis=1, keepdims=True)
    logp = z - jnp.log(jnp.sum(jnp.exp(z), axis=1, keepdims=True))

    # ---- lane-dense (8,128) output, one value per sublane row (no lane concat)
    out_ref[...] = jnp.zeros_like(out_ref)
    out_ref[0:1, 0:OUT] = logp
    out_ref[1:2, 0:ML] = attn_w
    for l in range(NL):
        out_ref[2 + l:3 + l, 0:H] = hs[l]


def init_params(key, hidden_size=HIDDEN, output_size=OUTPUT,
                num_layers=NUM_LAYERS, max_length=MAX_LENGTH):
    ks = jax.random.split(key, 11)
    s = 0.1
    f32 = jnp.float32
    return {
        "embedding": jax.random.normal(ks[0], (output_size, hidden_size), f32) * s,
        "w_attn":    jax.random.normal(ks[1], (2 * hidden_size, max_length), f32) * s,
        "b_attn":    jax.random.normal(ks[2], (1, max_length), f32) * s,
        "w_comb":    jax.random.normal(ks[3], (2 * hidden_size, hidden_size), f32) * s,
        "b_comb":    jax.random.normal(ks[4], (1, hidden_size), f32) * s,
        "w_ih":      jax.random.normal(ks[5], (num_layers, hidden_size, 4 * hidden_size), f32) * s,
        # w_hh exists in the module but never contributes (h0 == 0):
        "w_hh":      jax.random.normal(ks[6], (num_layers, hidden_size, 4 * hidden_size), f32) * s,
        "b_ih":      jax.random.normal(ks[7], (num_layers, 1, 4 * hidden_size), f32) * s,
        "b_hh":      jax.random.normal(ks[8], (num_layers, 1, 4 * hidden_size), f32) * s,
        "w_out":     jax.random.normal(ks[9], (hidden_size, output_size), f32) * s,
        "b_out":     jax.random.normal(ks[10], (1, output_size), f32) * s,
    }


def pack_params(params):
    """Fold embedding + attention/combine biases into a gatherable f32 constant
    slab and pack all remaining weights into one bf16 slab."""
    E = params["embedding"]
    OUT, H = E.shape
    ML = params["w_attn"].shape[1]
    NL = params["w_ih"].shape[0]
    assert 4 * H <= 128 and ML + H <= 128 and OUT <= 128
    assert 2 + NL <= 8                     # output rows fit the (8, 128) slab

    # --- f32 constant slab (OUT, 2+NL, 128), gathered per token via index_map.
    front_e = jnp.zeros((OUT, 128), jnp.float32)
    front_e = front_e.at[:, 0:ML].set(E @ params["w_attn"][0:H] + params["b_attn"])
    front_e = front_e.at[:, ML:ML + H].set(E @ params["w_comb"][0:H] + params["b_comb"])
    nrow = 2 + NL
    const = jnp.zeros((OUT, nrow, 128), jnp.float32)
    const = const.at[:, 0, :].set(front_e)
    for l in range(NL):
        const = const.at[:, 1 + l, 0:4 * H].set(params["b_ih"][l, 0] + params["b_hh"][l, 0])
    const = const.at[:, 1 + NL, 0:OUT].set(params["b_out"][0])

    # --- bf16 weight slab (H, 128*(NL+3)); each matmul RHS starts at a
    #     128-lane-aligned static window.
    nblk = NL + 3
    w = jnp.zeros((H, 128 * nblk), jnp.float32)
    w = w.at[:, 0:ML].set(params["w_attn"][H:2 * H])        # block 0: W_attn_h
    w = w.at[:, 128:128 + H].set(params["w_comb"][H:2 * H])  # block 1: W_comb_a (for E')
    for l in range(NL):
        w = w.at[:, 128 * (2 + l):128 * (2 + l) + 4 * H].set(params["w_ih"][l])
    w = w.at[:, 128 * (2 + NL):128 * (2 + NL) + OUT].set(params["w_out"])

    return {"const": const, "w": w.astype(jnp.bfloat16)}


@jax.jit
def attn_decoder_forward(token, hidden, encoder_outputs, packed):
    """token: scalar index; hidden: (num_layers, 1, H); encoder_outputs: (max_length, H).
    Returns (log_probs (1,OUT), h_n (NL,1,H), attn_weights (1,ML)) like the PyTorch module."""
    const = packed["const"]
    w = packed["w"]
    OUT, nrow, _ = const.shape
    ML, H = encoder_outputs.shape
    NL = nrow - 2

    tok = jnp.asarray(token, jnp.int32).reshape((1,))
    # single activation slab: rows 0:ML = encoder_outputs, row ML = hidden[0]
    act = jnp.concatenate([encoder_outputs.astype(jnp.float32),
                           hidden[0].astype(jnp.float32)], axis=0)     # (ML+1, H)

    kernel = functools.partial(attn_decoder_kernel, hidden_size=H,
                               output_size=OUT, max_length=ML, num_layers=NL)
    grid_spec = pltpu.PrefetchScalarGridSpec(
        num_scalar_prefetch=1,
        grid=(1,),
        in_specs=[
            # token-row gather of the constant slab (data-dependent index_map)
            pl.BlockSpec((1, nrow, 128), lambda i, tok: (tok[0], 0, 0)),
            pl.BlockSpec((ML + 1, H), lambda i, tok: (0, 0)),
            pl.BlockSpec((H, w.shape[1]), lambda i, tok: (0, 0)),
        ],
        out_specs=pl.BlockSpec((8, 128), lambda i, tok: (0, 0)),
    )
    out = pl.pallas_call(
        kernel,
        out_shape=jax.ShapeDtypeStruct((8, 128), jnp.float32),
        grid_spec=grid_spec,
        compiler_params=pltpu.CompilerParams(dimension_semantics=("arbitrary",)),
    )(tok, const, act, w)

    log_probs = out[0:1, 0:OUT]
    attn_weights = out[1:2, 0:ML]
    h_n = out[2:2 + NL, 0:H].reshape(NL, 1, H)
    return log_probs, h_n, attn_weights


def reference_forward(token, hidden, encoder_outputs, params):
    """Pure-JAX f32 reference with the FULL LSTM formula (h0 = c0 = 0)."""
    H = params["embedding"].shape[1]
    NL = params["w_ih"].shape[0]
    e = params["embedding"][token][None, :]
    attn_w = jax.nn.softmax(
        jnp.concatenate([e, hidden[0]], axis=1) @ params["w_attn"] + params["b_attn"], axis=1)
    ctx = attn_w @ encoder_outputs
    x = jax.nn.relu(
        jnp.concatenate([e, ctx], axis=1) @ params["w_comb"] + params["b_comb"])
    h0 = jnp.zeros((1, H), jnp.float32)
    c0 = jnp.zeros((1, H), jnp.float32)
    hs = []
    for l in range(NL):
        gates = (x @ params["w_ih"][l] + h0 @ params["w_hh"][l]
                 + params["b_ih"][l] + params["b_hh"][l])
        i_g = jax.nn.sigmoid(gates[:, 0:H])
        f_g = jax.nn.sigmoid(gates[:, H:2 * H])
        g_g = jnp.tanh(gates[:, 2 * H:3 * H])
        o_g = jax.nn.sigmoid(gates[:, 3 * H:4 * H])
        c = f_g * c0 + i_g * g_g
        h = o_g * jnp.tanh(c)
        hs.append(h)
        x = h
    log_probs = jax.nn.log_softmax(x @ params["w_out"] + params["b_out"], axis=1)
    return log_probs, jnp.stack(hs), attn_w


if __name__ == "__main__":
    key = jax.random.PRNGKey(0)
    pkey, ekey, hkey = jax.random.split(key, 3)

    params = init_params(pkey)
    packed = pack_params(params)

    # The original module only executes without error when input == 1
    # (h0/c0 batch dim must equal the LSTM batch dim of 1), so use token 1.
    token = 1
    hidden = jax.random.normal(hkey, (NUM_LAYERS, 1, HIDDEN), jnp.float32)
    encoder_outputs = jax.random.normal(ekey, (MAX_LENGTH, HIDDEN), jnp.float32)

    log_probs, h_n, attn_weights = attn_decoder_forward(token, hidden, encoder_outputs, packed)
    jax.block_until_ready((log_probs, h_n, attn_weights))

    assert log_probs.shape == (1, OUTPUT)
    assert h_n.shape == (NUM_LAYERS, 1, HIDDEN)
    assert attn_weights.shape == (1, MAX_LENGTH)

    # sanity: attn softmax sums to ~1 (approx reciprocal); log_softmax exp-sums to 1
    assert abs(float(jnp.sum(attn_weights)) - 1.0) < 2e-2
    assert abs(float(jnp.sum(jnp.exp(log_probs))) - 1.0) < 1e-3

    # pure-JAX f32 reference check (kernel uses bf16 MXU operands, a re-associated
    # context matmul and approx EUP reciprocal -> loosened tolerances).
    ref_lp, ref_hn, ref_aw = reference_forward(token, hidden, encoder_outputs, params)
    assert jnp.allclose(log_probs, ref_lp, atol=2e-2, rtol=2e-2)
    assert jnp.allclose(h_n, ref_hn, atol=2e-2, rtol=2e-2)
    assert jnp.allclose(attn_weights, ref_aw, atol=2e-2, rtol=2e-2)

    print("KERNEL_OK")
</pallas_src>

<mosaic_0001>
module attributes {stable_mosaic.version = 11 : i64} {
  func.func @attn_decoder_kernel(%arg0: i32, %arg1: memref<1xi32, #tpu.memory_space<smem>>, %arg2: memref<1x4x128xf32, #tpu.memory_space<vmem>>, %arg3: memref<11x32xf32, #tpu.memory_space<vmem>>, %arg4: memref<32x640xbf16, #tpu.memory_space<vmem>>, %arg5: memref<8x128xf32, #tpu.memory_space<vmem>>) attributes {dimension_semantics = [#tpu.dimension_semantics<arbitrary>], iteration_bounds = array<i64: 1>, scalar_prefetch = 1 : i64, scratch_operands = 0 : i64, tpu.core_type = #tpu.core_type<tc>, window_params = [{transform_indices = @transform_0, window_bounds = array<i64: 1, 4, 128>}, {pipeline_mode = #tpu.pipeline_mode<synchronous>, transform_indices = @transform_1, window_bounds = array<i64: 11, 32>}, {pipeline_mode = #tpu.pipeline_mode<synchronous>, transform_indices = @transform_2, window_bounds = array<i64: 32, 640>}, {pipeline_mode = #tpu.pipeline_mode<synchronous>, transform_indices = @transform_3, window_bounds = array<i64: 8, 128>}]} {
    %c0 = arith.constant 0 : index
    %c0_0 = arith.constant 0 : index
    %c0_1 = arith.constant 0 : index
    %0 = vector.load %arg2[%c0, %c0_0, %c0_1] : memref<1x4x128xf32, #tpu.memory_space<vmem>>, vector<1x4x128xf32>
    %1 = vector.shape_cast %0 : vector<1x4x128xf32> to vector<4x128xf32>
    %2 = vector.extract_strided_slice %1 {offsets = [0, 0], sizes = [1, 128], strides = [1, 1]} : vector<4x128xf32> to vector<1x128xf32>
    %c0_2 = arith.constant 0 : index
    %c0_3 = arith.constant 0 : index
    %3 = vector.load %arg3[%c0_2, %c0_3] : memref<11x32xf32, #tpu.memory_space<vmem>>, vector<10x32xf32>
    %4 = arith.truncf %3 : vector<10x32xf32> to vector<10x32xbf16>
    %c10 = arith.constant 10 : index
    %c0_4 = arith.constant 0 : index
    %5 = vector.load %arg3[%c10, %c0_4] : memref<11x32xf32, #tpu.memory_space<vmem>>, vector<1x32xf32>
    %6 = arith.truncf %5 : vector<1x32xf32> to vector<1x32xbf16>
    %c0_5 = arith.constant 0 : index
    %c128 = arith.constant 128 : index
    %7 = vector.load %arg4[%c0_5, %c128] : memref<32x640xbf16, #tpu.memory_space<vmem>>, vector<32x32xbf16>
    %cst = arith.constant dense<0.000000e+00> : vector<10x32xf32>
    %8 = tpu.matmul %4, %7, %cst {dimension_numbers = #tpu.dot_dimension_numbers<[1], [0], [0], [1], [0, 0, 1, 1], [], []>} : vector<10x32xbf16>, vector<32x32xbf16>, vector<10x32xf32> -> vector<10x32xf32>
    %c0_6 = arith.constant 0 : index
    %c0_7 = arith.constant 0 : index
    %9 = vector.load %arg4[%c0_6, %c0_7] : memref<32x640xbf16, #tpu.memory_space<vmem>>, vector<32x128xbf16>
    %cst_8 = arith.constant dense<0.000000e+00> : vector<1x128xf32>
    %10 = tpu.matmul %6, %9, %cst_8 {dimension_numbers = #tpu.dot_dimension_numbers<[1], [0], [0], [1], [0, 0, 1, 1], [], []>} : vector<1x32xbf16>, vector<32x128xbf16>, vector<1x128xf32> -> vector<1x128xf32>
    %11 = vector.extract_strided_slice %2 {offsets = [0, 0], sizes = [1, 10], strides = [1, 1]} : vector<1x128xf32> to vector<1x10xf32>
    %12 = vector.extract_strided_slice %10 {offsets = [0, 0], sizes = [1, 10], strides = [1, 1]} : vector<1x128xf32> to vector<1x10xf32>
    %13 = arith.addf %11, %12 : vector<1x10xf32>
    %cst_9 = arith.constant dense<0xFF800000> : vector<1xf32>
    %14 = vector.multi_reduction <maximumf>, %13, %cst_9 [1] : vector<1x10xf32> to vector<1xf32>
    %15 = vector.shape_cast %14 : vector<1xf32> to vector<1x1xf32>
    %16 = vector.broadcast %15 : vector<1x1xf32> to vector<1x10xf32>
    %17 = arith.subf %13, %16 : vector<1x10xf32>
    %18 = math.exp %17 : vector<1x10xf32>
    %cst_10 = arith.constant dense<0.000000e+00> : vector<1xf32>
    %19 = vector.multi_reduction <add>, %18, %cst_10 [1] : vector<1x10xf32> to vector<1xf32>
    %20 = vector.shape_cast %19 : vector<1xf32> to vector<1x1xf32>
    %21 = tpu.reciprocal %20 {approx = true} : vector<1x1xf32> -> vector<1x1xf32>
    %22 = vector.broadcast %21 : vector<1x1xf32> to vector<1x10xf32>
    %23 = arith.mulf %18, %22 : vector<1x10xf32>
    %24 = vector.extract_strided_slice %2 {offsets = [0, 10], sizes = [1, 32], strides = [1, 1]} : vector<1x128xf32> to vector<1x32xf32>
    %25 = arith.truncf %23 : vector<1x10xf32> to vector<1x10xbf16>
    %26 = arith.truncf %8 : vector<10x32xf32> to vector<10x32xbf16>
    %cst_11 = arith.constant dense<0.000000e+00> : vector<1x32xf32>
    %27 = tpu.matmul %25, %26, %cst_11 {dimension_numbers = #tpu.dot_dimension_numbers<[1], [0], [0], [1], [0, 0, 1, 1], [], []>} : vector<1x10xbf16>, vector<10x32xbf16>, vector<1x32xf32> -> vector<1x32xf32>
    %28 = arith.addf %24, %27 : vector<1x32xf32>
    %cst_12 = arith.constant 0.000000e+00 : f32
    %29 = vector.broadcast %cst_12 : f32 to vector<1x32xf32>
    %30 = arith.maximumf %28, %29 : vector<1x32xf32>
    %31 = arith.truncf %30 : vector<1x32xf32> to vector<1x32xbf16>
    %c0_13 = arith.constant 0 : index
    %c256 = arith.constant 256 : index
    %32 = vector.load %arg4[%c0_13, %c256] : memref<32x640xbf16, #tpu.memory_space<vmem>>, vector<32x128xbf16>
    %cst_14 = arith.constant dense<0.000000e+00> : vector<1x128xf32>
    %33 = tpu.matmul %31, %32, %cst_14 {dimension_numbers = #tpu.dot_dimension_numbers<[1], [0], [0], [1], [0, 0, 1, 1], [], []>} : vector<1x32xbf16>, vector<32x128xbf16>, vector<1x128xf32> -> vector<1x128xf32>
    %34 = vector.extract_strided_slice %1 {offsets = [1, 0], sizes = [1, 128], strides = [1, 1]} : vector<4x128xf32> to vector<1x128xf32>
    %35 = arith.addf %33, %34 : vector<1x128xf32>
    %36 = vector.extract_strided_slice %35 {offsets = [0, 0], sizes = [1, 32], strides = [1, 1]} : vector<1x128xf32> to vector<1x32xf32>
    %37 = arith.negf %36 : vector<1x32xf32>
    %38 = math.exp %37 : vector<1x32xf32>
    %cst_15 = arith.constant 1.000000e+00 : f32
    %39 = vector.broadcast %cst_15 : f32 to vector<1x32xf32>
    %40 = arith.addf %39, %38 : vector<1x32xf32>
    %41 = arith.divf %39, %40 : vector<1x32xf32>
    %42 = vector.extract_strided_slice %35 {offsets = [0, 64], sizes = [1, 32], strides = [1, 1]} : vector<1x128xf32> to vector<1x32xf32>
    %43 = math.tanh %42 : vector<1x32xf32>
    %44 = vector.extract_strided_slice %35 {offsets = [0, 96], sizes = [1, 32], strides = [1, 1]} : vector<1x128xf32> to vector<1x32xf32>
    %45 = arith.negf %44 : vector<1x32xf32>
    %46 = math.exp %45 : vector<1x32xf32>
    %cst_16 = arith.constant 1.000000e+00 : f32
    %47 = vector.broadcast %cst_16 : f32 to vector<1x32xf32>
    %48 = arith.addf %47, %46 : vector<1x32xf32>
    %49 = arith.divf %47, %48 : vector<1x32xf32>
    %50 = arith.mulf %41, %43 : vector<1x32xf32>
    %51 = math.tanh %50 : vector<1x32xf32>
    %52 = arith.mulf %49, %51 : vector<1x32xf32>
    %53 = arith.truncf %52 : vector<1x32xf32> to vector<1x32xbf16>
    %c0_17 = arith.constant 0 : index
    %c384 = arith.constant 384 : index
    %54 = vector.load %arg4[%c0_17, %c384] : memref<32x640xbf16, #tpu.memory_space<vmem>>, vector<32x128xbf16>
    %cst_18 = arith.constant dense<0.000000e+00> : vector<1x128xf32>
    %55 = tpu.matmul %53, %54, %cst_18 {dimension_numbers = #tpu.dot_dimension_numbers<[1], [0], [0], [1], [0, 0, 1, 1], [], []>} : vector<1x32xbf16>, vector<32x128xbf16>, vector<1x128xf32> -> vector<1x128xf32>
    %56 = vector.extract_strided_slice %1 {offsets = [2, 0], sizes = [1, 128], strides = [1, 1]} : vector<4x128xf32> to vector<1x128xf32>
    %57 = arith.addf %55, %56 : vector<1x128xf32>
    %58 = vector.extract_strided_slice %57 {offsets = [0, 0], sizes = [1, 32], strides = [1, 1]} : vector<1x128xf32> to vector<1x32xf32>
    %59 = arith.negf %58 : vector<1x32xf32>
    %60 = math.exp %59 : vector<1x32xf32>
    %cst_19 = arith.constant 1.000000e+00 : f32
    %61 = vector.broadcast %cst_19 : f32 to vector<1x32xf32>
    %62 = arith.addf %61, %60 : vector<1x32xf32>
    %63 = arith.divf %61, %62 : vector<1x32xf32>
    %64 = vector.extract_strided_slice %57 {offsets = [0, 64], sizes = [1, 32], strides = [1, 1]} : vector<1x128xf32> to vector<1x32xf32>
    %65 = math.tanh %64 : vector<1x32xf32>
    %66 = vector.extract_strided_slice %57 {offsets = [0, 96], sizes = [1, 32], strides = [1, 1]} : vector<1x128xf32> to vector<1x32xf32>
    %67 = arith.negf %66 : vector<1x32xf32>
    %68 = math.exp %67 : vector<1x32xf32>
    %cst_20 = arith.constant 1.000000e+00 : f32
    %69 = vector.broadcast %cst_20 : f32 to vector<1x32xf32>
    %70 = arith.addf %69, %68 : vector<1x32xf32>
    %71 = arith.divf %69, %70 : vector<1x32xf32>
    %72 = arith.mulf %63, %65 : vector<1x32xf32>
    %73 = math.tanh %72 : vector<1x32xf32>
    %74 = arith.mulf %71, %73 : vector<1x32xf32>
    %75 = arith.truncf %74 : vector<1x32xf32> to vector<1x32xbf16>
    %c0_21 = arith.constant 0 : index
    %c512 = arith.constant 512 : index
    %76 = vector.load %arg4[%c0_21, %c512] : memref<32x640xbf16, #tpu.memory_space<vmem>>, vector<32x24xbf16>
    %cst_22 = arith.constant dense<0.000000e+00> : vector<1x24xf32>
    %77 = tpu.matmul %75, %76, %cst_22 {dimension_numbers = #tpu.dot_dimension_numbers<[1], [0], [0], [1], [0, 0, 1, 1], [], []>} : vector<1x32xbf16>, vector<32x24xbf16>, vector<1x24xf32> -> vector<1x24xf32>
    %78 = vector.extract_strided_slice %1 {offsets = [3, 0], sizes = [1, 24], strides = [1, 1]} : vector<4x128xf32> to vector<1x24xf32>
    %79 = arith.addf %77, %78 : vector<1x24xf32>
    %cst_23 = arith.constant dense<0xFF800000> : vector<1xf32>
    %80 = vector.multi_reduction <maximumf>, %79, %cst_23 [1] : vector<1x24xf32> to vector<1xf32>
    %81 = vector.shape_cast %80 : vector<1xf32> to vector<1x1xf32>
    %82 = vector.broadcast %81 : vector<1x1xf32> to vector<1x24xf32>
    %83 = arith.subf %79, %82 : vector<1x24xf32>
    %84 = math.exp %83 : vector<1x24xf32>
    %cst_24 = arith.constant dense<0.000000e+00> : vector<1xf32>
    %85 = vector.multi_reduction <add>, %84, %cst_24 [1] : vector<1x24xf32> to vector<1xf32>
    %86 = vector.shape_cast %85 : vector<1xf32> to vector<1x1xf32>
    %87 = math.log %86 : vector<1x1xf32>
    %88 = vector.broadcast %87 : vector<1x1xf32> to vector<1x24xf32>
    %89 = arith.subf %83, %88 : vector<1x24xf32>
    %cst_25 = arith.constant 0.000000e+00 : f32
    %90 = vector.broadcast %cst_25 : f32 to vector<8x128xf32>
    %c0_26 = arith.constant 0 : index
    %c0_27 = arith.constant 0 : index
    %91 = vector.load %arg5[%c0_26, %c0_27] : memref<8x128xf32, #tpu.memory_space<vmem>>, vector<8x128xf32>
    tpu.vector_store %arg5[%c0_26, %c0_27], %90 {strides = array<i32>} : memref<8x128xf32, #tpu.memory_space<vmem>>, vector<8x128xf32>,
    %c0_28 = arith.constant 0 : index
    %c0_29 = arith.constant 0 : index
    %92 = vector.load %arg5[%c0_28, %c0_29] : memref<8x128xf32, #tpu.memory_space<vmem>>, vector<1x24xf32>
    tpu.vector_store %arg5[%c0_28, %c0_29], %89 {strides = array<i32>} : memref<8x128xf32, #tpu.memory_space<vmem>>, vector<1x24xf32>,
    %c1 = arith.constant 1 : index
    %c0_30 = arith.constant 0 : index
    %93 = vector.load %arg5[%c1, %c0_30] : memref<8x128xf32, #tpu.memory_space<vmem>>, vector<1x10xf32>
    tpu.vector_store %arg5[%c1, %c0_30], %23 {strides = array<i32>} : memref<8x128xf32, #tpu.memory_space<vmem>>, vector<1x10xf32>,
    %c2 = arith.constant 2 : index
    %c0_31 = arith.constant 0 : index
    %94 = vector.load %arg5[%c2, %c0_31] : memref<8x128xf32, #tpu.memory_space<vmem>>, vector<1x32xf32>
    tpu.vector_store %arg5[%c2, %c0_31], %52 {strides = array<i32>} : memref<8x128xf32, #tpu.memory_space<vmem>>, vector<1x32xf32>,
    %c3 = arith.constant 3 : index
    %c0_32 = arith.constant 0 : index
    %95 = vector.load %arg5[%c3, %c0_32] : memref<8x128xf32, #tpu.memory_space<vmem>>, vector<1x32xf32>
    tpu.vector_store %arg5[%c3, %c0_32], %74 {strides = array<i32>} : memref<8x128xf32, #tpu.memory_space<vmem>>, vector<1x32xf32>,
    return
  }
  func.func @transform_0(%arg0: i32, %arg1: memref<1xi32, #tpu.memory_space<smem>>) -> (i32, i32, i32) {
    %c0 = arith.constant 0 : index
    %0 = memref.load %arg1[%c0] : memref<1xi32, #tpu.memory_space<smem>>
    %c0_i32 = arith.constant 0 : i32
    %c0_i32_0 = arith.constant 0 : i32
    %c0_i32_1 = arith.constant 0 : i32
    return %0, %c0_i32, %c0_i32_0 : i32, i32, i32
  }
  func.func @transform_1(%arg0: i32, %arg1: memref<1xi32, #tpu.memory_space<smem>>) -> (i32, i32) {
    %c0_i32 = arith.constant 0 : i32
    %c0_i32_0 = arith.constant 0 : i32
    %c0_i32_1 = arith.constant 0 : i32
    return %c0_i32, %c0_i32_0 : i32, i32
  }
  func.func @transform_2(%arg0: i32, %arg1: memref<1xi32, #tpu.memory_space<smem>>) -> (i32, i32) {
    %c0_i32 = arith.constant 0 : i32
    %c0_i32_0 = arith.constant 0 : i32
    %c0_i32_1 = arith.constant 0 : i32
    return %c0_i32, %c0_i32_0 : i32, i32
  }
  func.func @transform_3(%arg0: i32, %arg1: memref<1xi32, #tpu.memory_space<smem>>) -> (i32, i32) {
    %c0_i32 = arith.constant 0 : i32
    %c0_i32_0 = arith.constant 0 : i32
    %c0_i32_1 = arith.constant 0 : i32
    return %c0_i32, %c0_i32_0 : i32, i32
  }
}

</mosaic_0001>

<bundles_post_ra>
// kernel: attn_decoder_forward.1
= control target key start
LH: loop header
LB: loop body
LE: loop exit
PB: predicated region body
PF: predicated region fallthrough
CT: control target
= control target key end

     0   :  { %10 = vsyncpa [#allocation5], 0  ;;  %s624_s0 = inlined_call_operand.<no memory space> [shape: s32[1], index: 0, kind: input, shape index: {}]   ;;  %s625_s1 = inlined_call_operand.hbm [shape: f32[24,4,128], index: 1, kind: input, shape index: {}]   ;;  %s626_s2 = inlined_call_operand.vmem [shape: f32[11,32], index: 2, kind: input, shape index: {}]   ;;  %s627_s3 = inlined_call_operand.hbm [shape: bf16[32,640], index: 3, kind: input, shape index: {}]   ;;  %s628_s4 = inlined_call_operand.vmem [shape: f32[8,128], index: 4, kind: output, shape index: {}]  }
   0x1   :  { %s377_s17 = sshll.u32 %s624_s0, 2 }
   0x2   :  { %11 = vsyncpa [#allocation7], 0  ;;  %s18_s20 = scalar_lea.hbm %s625_s1, %s377_s17  ;;  %s522_s21 = smov [#allocation4]  }
   0x3   :  { %s22_s22 = sshll.u32 %s522_s21, 4  ;;  %s20_s23 = sshll.u32 %s18_s20, 4  ;;  %s23_s22 = int_to_ptr.vmem [resolvable:$true] %s22_s22  ;;  %s21_s23 = int_to_ptr.hbm [resolvable:$true] %s20_s23 }
   0x4   :  { %s32_s26 = sshll.u32 %s627_s3, 4  ;;  %s470_s27 = sshra.s32 %s21_s23, 4  ;;  %s471_s27 = int_to_ptr.hbm [resolvable:$true] %s470_s27  ;;  %s33_s26 = int_to_ptr.hbm [resolvable:$true] %s32_s26 }
   0x5   :  { %s472_s28 = scalar_lea.hbm %s471_s27, 4  ;;  %s474_s30 = scalar_lea.hbm %s625_s1, 96 }
   0x6   :  { %p473_p0 = scmp.ne.s32.totalorder %s471_s27, %s472_s28  ;;  %p475_p1 = scmp.lt.s32.totalorder %s471_s27, %s625_s1 }
   0x7   :  { %p476_p2 = scmp.lt.s32.totalorder %s474_s30, %s472_s28 }
   0x9   :  { %p477_p3 = por %p476_p2, %p475_p1 }
   0xb   :  { %p478_p4 = pnand %p477_p3, %p473_p0 }
   0xd   :  { %481 = shalt.err (!%p478_p4)
}
   0xe   :  { %25 = dma.hbm_to_vmem [thread:$0]  %s21_s23, 64, %s23_s22, [#allocation5]  }
   0xf   :  { %s523_s7 = smov [#allocation6]   ;;  %s524_s8 = smov 320  }
  0x10   :  { %s34_s3 = sshll.u32 %s523_s7, 4  ;;  %s525_s9 = smov 20   ;;  %s35_s3 = int_to_ptr.vmem [resolvable:$true] %s34_s3 }
  0x11   :  { %40 = dma.hbm_to_vmem [thread:$0]  %s33_s26, 1280, %s35_s3, [#allocation7], %s524_s8, %s524_s8, %s525_s9  }
  0x12   :  { %518 = dma.done.wait [#allocation5], 64  }
  0x13   :  { %519 = vsyncadd [#allocation5], 4294967232 }
  0x14   :  { %520 = dma.done.wait [#allocation7], 1280  }
  0x15   :  { %521 = vsyncadd [#allocation7], 4294966016  ;;  %v393_v0 = vld [vmem:[#allocation6 + $0x28] sm:$0xf]  ;;  %v429_v1 = vld [vmem:[#allocation6 + $0x38] sm:$0xf0] }
  0x16   :  { %v389_v2 = vld [vmem:[#allocation6] sm:$0xf]  ;;  %v394_v3 = vor.u32 %v429_v1, %v393_v0  ;;  %v428_v4 = vld [vmem:[#allocation6 + $0x10] sm:$0xf0]  ;;  %v55_v6 = vld [vmem:[%s626_s2 + $0xa] sm:$0x1] }
  0x17   :  { %v390_v5 = vor.u32 %v428_v4, %v389_v2  ;;  %v56_v7 = vpack.c.bf16 %v55_v6, %v55_v6  ;;  %vm73_vm0 = vcmask 261120   ;;  %v384_v8 = vld [vmem:[#allocation6 + $0x2c] sm:$0xf]  ;;  %v427_v9 = vld [vmem:[#allocation6 + $0x3c] sm:$0xf0]  ;;  %vm124_vm1 = vcmask 73728  }
  0x18   :  { %116 = vmatpush.bf16.msra.mxu1 %v394_v3  ;;  %v380_v10 = vld [vmem:[#allocation6 + $0x4] sm:$0xf]  ;;  %v385_v11 = vor.u32 %v427_v9, %v384_v8  ;;  %v426_v12 = vld [vmem:[#allocation6 + $0x14] sm:$0xf0]  ;;  %v52_v14 = vld [vmem:[%s626_s2] sm:$0xff]  ;;  %vm142_vm2 = vcmask 1044480  }
  0x19   :  { %v381_v13 = vor.u32 %v426_v12, %v380_v10  ;;  %v53_v15 = vld [vmem:[%s626_s2 + $0x8] sm:$0x3]  ;;  %v583_v17 = vld [vmem:[#allocation4] sm:$0xf]  ;;  %v526_v31 = vmov 0.0   ;;  %vm138_vm3 = vcmask 80896  }
  0x1a   :  { %83 = vmatpush.bf16.msra.mxu0 %v385_v11  ;;  %v54_v16 = vpack.c.bf16 %v53_v15, %v52_v14  ;;  %355 = vst [vmem:[%s628_s4] sm:$0xff] %v526_v31  ;;  %s527_s18 = smov 10   ;;  %v403_v38 = vld [vmem:[#allocation6 + $0x30] sm:$0xf]  ;;  %v431_v39 = vld [vmem:[#allocation6 + $0x40] sm:$0xf0]  ;;  %s528_s19 = smov 118  }
  0x1b   :  { %v399_v40 = vld [vmem:[#allocation6 + $0x8] sm:$0xf]  ;;  %v404_v41 = vor.u32 %v431_v39, %v403_v38  ;;  %v430_v42 = vld [vmem:[#allocation6 + $0x18] sm:$0xf0]  ;;  %v186_v49 = vrot.slane %v583_v17, 1  ;;  %s529_s20 = smov 64  }
  0x1c   :  { %117 = vmatpush.bf16.msra.mxu1 %v390_v5  ;;  %v400_v43 = vor.u32 %v430_v42, %v399_v40  ;;  %s530_s21 = smov 96   ;;  %v413_v6 = vld [vmem:[#allocation6 + $0x34] sm:$0xf]  ;;  %v409_v8 = vld [vmem:[#allocation6 + $0xc] sm:$0xf]  ;;  %s531_s22 = smov 32  }
  0x1d   :  { %197 = vmatpush.bf16.msra.mxu3 %v404_v41  ;;  %v432_v10 = vld [vmem:[#allocation6 + $0x1c] sm:$0xf0]  ;;  %vm362_vm8 = vcmask 253952   ;;  %v423_v39 = vld [vmem:[#allocation6 + $0x38] sm:$0xf]  ;;  %vm342_vm13 = vcmask 188416  }
  0x1e   :  { %84 = vmatpush.bf16.msra.mxu0 %v381_v13  ;;  %v410_v11 = vor.u32 %v432_v10, %v409_v8  ;;  %v435_v40 = vld [vmem:[#allocation6 + $0x48] sm:$0xf0]  ;;  %v419_v41 = vld [vmem:[#allocation6 + $0x10] sm:$0xf] }
  0x1f   :  { %395 = vmatmul.msk.bf16.vlgmr.msra.gmra.mxu1 %vm73_vm0, %v56_v7  ;;  %v433_v7 = vld [vmem:[#allocation6 + $0x44] sm:$0xf0]  ;;  %v424_v42 = vor.u32 %v435_v40, %v423_v39 }
  0x20   :  { %v414_v9 = vor.u32 %v433_v7, %v413_v6 }
  0x21   :  { %386 = vmatmul.msk.bf16.vlgmr.msra.gmra.mxu0 %vm73_vm0, %v54_v16  ;;  %198 = vmatpush.bf16.msra.mxu3 %v400_v43  ;;  %v434_v43 = vld [vmem:[#allocation6 + $0x20] sm:$0xf0] }
  0x22   :  { %335 = vmatpush.bf16.msrb.mxu0 %v424_v42 }
  0x9c   :  { %v119_v18 = vpop.f32.mrf.mxu1 }
  0x9d   :  { %v123_v19 = vadd.f32 %v119_v18, %v583_v17  ;;  %v255_v18 = vrot.slane %v583_v17, 2 }
  0x9e   :  { %v86_v27 = vpop.f32.mrf.mxu0 }
  0x9f   :  { %v125_v20 = vsel %vm124_vm1, %v123_v19, -inf }
  0xa0   :  { %126 = vmax.xlane.f32.xlu0 %v125_v20 }
  0xa4   :  { %v121_v21 = vpop.f32.mrf.mxu1 }
  0xa6   :  { %v88_v28 = vpop.f32.mrf.mxu0 }
  0xa7   :  { %v137_v29 = vpack.c.bf16 %v88_v28, %v86_v27 }
  0xa9   :  { %v144_v30 = vsel %vm142_vm2, %v137_v29, 0 }
  0xaa   :  { %153 = vmatpush.bf16.msra.mxu2 %v144_v30 }
  0xae   :  { %266 = vmatpush.bf16.msrb.mxu2 %v414_v9 }
  0xb2   :  { %267 = vmatpush.bf16.msrb.mxu2 %v410_v11 }
 0x113   :  { %v127_v22 = vpop.xlane.xlu0 %126 }
 0x114   :  { %v128_v23 = vsub.f32 %v123_v19, %v127_v22 }
 0x116   :  { %v129_v24 = vmul.f32 1.442695, %v128_v23 }
 0x118   :  { %446 = vpow2.f32 %v129_v24 }
 0x11e   :  { %v447_v25 = vpop.eup %446 }
 0x11f   :  { %v131_v26 = vsel %vm124_vm1, %v447_v25, 0.0 }
 0x120   :  { %132 = vadd.xlane.f32.xlu0 %v131_v26 }
 0x193   :  { %v133_v32 = vpop.xlane.xlu0 %132 }
 0x194   :  { %448 = vrcp.f32 %v133_v32 }
 0x19a   :  { %v449_v33 = vpop.eup %448 }
 0x19b   :  { %v135_v34 = vmul.f32 %v449_v33, %v447_v25 }
 0x19d   :  { %v136_v35 = vpack.c.bf16 %v135_v34, %v135_v34  ;;  %357 = vst.msk [vmem:[%s628_s4 + $0x1] sm:$0x1] %vm124_vm1, %v135_v34 }
 0x19f   :  { %396 = vmatmul.msk.bf16.vlgmr.msra.gmra.mxu2 %vm138_vm3, %v136_v35 }
 0x222   :  { %v155_v36 = vpop.f32.mrf.mxu2 }
 0x223   :  { %160 = vrot.lane.b32.xlu1 %v155_v36, %s527_s18 }
 0x22a   :  { %v157_v37 = vpop.f32.mrf.mxu2 }
 0x295   :  { %v161_v44 = vpop.permute.xlu1 %160 }
 0x296   :  { %v163_v45 = vadd.f32 %v161_v44, %v583_v17  ;;  %v420_v44 = vor.u32 %v434_v43, %v419_v41 }
 0x298   :  { %v164_v46 = vmax.f32 %v163_v45, 0.0  ;;  %336 = vmatpush.bf16.msrb.mxu0 %v420_v44 }
 0x29a   :  { %v165_v47 = vpack.c.bf16 %v164_v46, %v164_v46 }
 0x29c   :  { %171 = vrot.lane.b32.xlu1 %v165_v47, %s528_s19 }
 0x30e   :  { %v172_v48 = vpop.permute.xlu1 %171 }
 0x30f   :  { %405 = vmatmul.msk.bf16.vlgmr.msra.gmra.mxu3 %vm73_vm0, %v172_v48 }
 0x392   :  { %v200_v50 = vpop.f32.mrf.mxu3 }
 0x393   :  { %v201_v51 = vadd.f32 %v200_v50, %v186_v49  ;;  %v324_v50 = vrot.slane %v583_v17, 3 }
 0x395   :  { %450 = vtanh.f32 %v201_v51  ;;  %v406_v54 = vmul.f32 -1.442695, %v201_v51 }
 0x397   :  { %452 = vpow2.f32 %v406_v54 }
 0x39a   :  { %v202_v52 = vpop.f32.mrf.mxu3 }
 0x39b   :  { %v451_v53 = vpop.eup %450 }
 0x39c   :  { %225 = vrot.lane.b32.xlu2 %v451_v53, %s529_s20 }
 0x39d   :  { %v453_v55 = vpop.eup %452 }
 0x39e   :  { %v207_v56 = vadd.f32 1.0, %v453_v55 }
 0x3a0   :  { %454 = vrcp.f32 %v207_v56  ;;  %v219_v62 = vand.u32 2147483648, %v207_v56  ;;  %vm213_vm5 = vweird.f32 %v207_v56  ;;  %v217_v63 = vand.u32 2147483647, %v207_v56 }
 0x3a2   :  { %v220_v1 = vor.u32 1.1754944e-38, %v219_v62  ;;  %vm218_vm7 = vcmp.eq.f32.partialorder %v217_v63, 8.507059e+37 }
 0x3a6   :  { %v455_v57 = vpop.eup %454 }
 0x3a7   :  { %v209_v58 = vmul.f32 %v455_v57, %v207_v56  ;;  %vm214_vm4 = vweird.f32 %v455_v57 }
 0x3a8   :  { %vm215_vm6 = vmor %vm213_vm5, %vm214_vm4 }
 0x3a9   :  { %v210_v59 = vsub.f32 1.0, %v209_v58 }
 0x3ab   :  { %v211_v60 = vmul.f32 %v455_v57, %v210_v59 }
 0x3ad   :  { %v212_v61 = vadd.f32 %v455_v57, %v211_v60 }
 0x3af   :  { %v216_v0 = vsel %vm215_vm6, %v455_v57, %v212_v61 }
 0x3b0   :  { %v221_v3 = vsel %vm218_vm7, %v220_v1, %v216_v0 }
 0x3f6   :  { %v226_v2 = vpop.permute.xlu2 %225 }
 0x3f7   :  { %v228_v4 = vmul.f32 %v226_v2, %v221_v3 }
 0x3f9   :  { %456 = vtanh.f32 %v228_v4 }
 0x3ff   :  { %v457_v5 = vpop.eup %456 }
 0x400   :  { %231 = vrot.lane.b32.xlu2 %v457_v5, %s530_s21 }
 0x45a   :  { %v232_v12 = vpop.permute.xlu2 %231 }
 0x45b   :  { %v234_v13 = vmul.f32 %v232_v12, %v221_v3 }
 0x45d   :  { %v235_v14 = vpack.c.bf16 %v234_v13, %v234_v13 }
 0x45f   :  { %241 = vrot.lane.b32.xlu0 %v235_v14, %s531_s22 }
 0x467   :  { %359 = vrot.lane.b32.xlu0 %v234_v13, %s531_s22 }
 0x4d1   :  { %v242_v15 = vpop.permute.xlu0 %241 }
 0x4d2   :  { %415 = vmatmul.msk.bf16.vlgmr.msrb.gmra.mxu2 %vm73_vm0, %v242_v15 }
 0x4d9   :  { %v360_v16 = vpop.permute.xlu0 %359 }
 0x4da   :  { %363 = vst.msk [vmem:[%s628_s4 + $0x2] sm:$0x1] %vm362_vm8, %v360_v16 }
 0x555   :  { %v269_v19 = vpop.f32.mrf.mxu2 }
 0x556   :  { %v270_v20 = vadd.f32 %v269_v19, %v255_v18 }
 0x558   :  { %458 = vtanh.f32 %v270_v20  ;;  %v416_v23 = vmul.f32 -1.442695, %v270_v20 }
 0x55a   :  { %460 = vpow2.f32 %v416_v23 }
 0x55d   :  { %v271_v21 = vpop.f32.mrf.mxu2 }
 0x55e   :  { %v459_v22 = vpop.eup %458 }
 0x55f   :  { %294 = vrot.lane.b32.xlu1 %v459_v22, %s529_s20 }
 0x560   :  { %v461_v24 = vpop.eup %460 }
 0x561   :  { %v276_v25 = vadd.f32 1.0, %v461_v24 }
 0x563   :  { %462 = vrcp.f32 %v276_v25  ;;  %v288_v31 = vand.u32 2147483648, %v276_v25  ;;  %vm282_vm10 = vweird.f32 %v276_v25  ;;  %v286_v32 = vand.u32 2147483647, %v276_v25 }
 0x565   :  { %v289_v34 = vor.u32 1.1754944e-38, %v288_v31  ;;  %vm287_vm12 = vcmp.eq.f32.partialorder %v286_v32, 8.507059e+37 }
 0x569   :  { %v463_v26 = vpop.eup %462 }
 0x56a   :  { %v278_v27 = vmul.f32 %v463_v26, %v276_v25  ;;  %vm283_vm9 = vweird.f32 %v463_v26 }
 0x56b   :  { %vm284_vm11 = vmor %vm282_vm10, %vm283_vm9 }
 0x56c   :  { %v279_v28 = vsub.f32 1.0, %v278_v27 }
 0x56e   :  { %v280_v29 = vmul.f32 %v463_v26, %v279_v28 }
 0x570   :  { %v281_v30 = vadd.f32 %v463_v26, %v280_v29 }
 0x572   :  { %v285_v33 = vsel %vm284_vm11, %v463_v26, %v281_v30 }
 0x573   :  { %v290_v36 = vsel %vm287_vm12, %v289_v34, %v285_v33 }
 0x5d1   :  { %v295_v35 = vpop.permute.xlu1 %294 }
 0x5d2   :  { %v297_v37 = vmul.f32 %v295_v35, %v290_v36 }
 0x5d4   :  { %464 = vtanh.f32 %v297_v37 }
 0x5da   :  { %v465_v38 = vpop.eup %464 }
 0x5db   :  { %300 = vrot.lane.b32.xlu2 %v465_v38, %s530_s21 }
 0x635   :  { %v301_v45 = vpop.permute.xlu2 %300 }
 0x636   :  { %v303_v46 = vmul.f32 %v301_v45, %v290_v36 }
 0x638   :  { %v304_v47 = vpack.c.bf16 %v303_v46, %v303_v46  ;;  %365 = vrot.lane.b32.xlu0 %v303_v46, %s531_s22 }
 0x63a   :  { %310 = vrot.lane.b32.xlu1 %v304_v47, %s531_s22 }
 0x6aa   :  { %v366_v48 = vpop.permute.xlu0 %365 }
 0x6ab   :  { %368 = vst.msk [vmem:[%s628_s4 + $0x3] sm:$0x1] %vm362_vm8, %v366_v48 }
 0x6ac   :  { %v311_v49 = vpop.permute.xlu1 %310 }
 0x6ad   :  { %425 = vmatmul.msk.bf16.vlgmr.msrb.gmra.mxu0 %vm73_vm0, %v311_v49 }
 0x72a   :  { %v338_v51 = vpop.f32.mrf.mxu0 }
 0x72b   :  { %v339_v52 = vadd.f32 %v338_v51, %v324_v50 }
 0x72d   :  { %v343_v53 = vsel %vm342_vm13, %v339_v52, -inf }
 0x72e   :  { %344 = vmax.xlane.f32.xlu2 %v343_v53 }
 0x732   :  { %v340_v54 = vpop.f32.mrf.mxu0 }
 0x7a1   :  { %v345_v55 = vpop.xlane.xlu2 %344 }
 0x7a2   :  { %v346_v56 = vsub.f32 %v339_v52, %v345_v55 }
 0x7a4   :  { %v347_v57 = vmul.f32 1.442695, %v346_v56 }
 0x7a6   :  { %466 = vpow2.f32 %v347_v57 }
 0x7ac   :  { %v467_v58 = vpop.eup %466 }
 0x7ad   :  { %v349_v59 = vsel %vm342_vm13, %v467_v58, 0.0 }
 0x7ae   :  { %350 = vadd.xlane.f32.xlu1 %v349_v59 }
 0x821   :  { %v351_v60 = vpop.xlane.xlu1 %350 }
 0x822   :  { %468 = vlog2.f32 %v351_v60 }
 0x828   :  { %v469_v61 = vpop.eup %468 }
 0x829   :  { %v353_v62 = vmul.f32 0.6931472, %v469_v61 }
 0x82b   :  { %v354_v17 = vsub.f32 %v346_v56, %v353_v62 }
 0x82d   :  { %356 = vst.msk [vmem:[%s628_s4] sm:$0x1] %vm342_vm13, %v354_v17 }
 0x82e   :  { %373 = vsyncpa [#allocation5], 1 }
 0x82f   :  { %374 = vsyncpa [#allocation7], 1 }

</bundles_post_ra>
